<compile_context>
chip_gen: v7x
topology: tpu7x:2x2x1
jax: 0.10.0
libtpu: 0.0.40
codegen_flags: <defaults>
</compile_context>

<pallas_src>
import jax
import jax.numpy as jnp
from jax.experimental import pallas as pl
from jax.experimental.pallas import tpu as pltpu

LANE = 128
MAX_TILE = 128 * 1024  # points per grid step (multiple of 128)


def sphere_sdf_kernel(center_ref, radius_ref, pts_ref, out_ref):
    # center_ref: (3,)      SMEM scalars
    # radius_ref: (1,)      SMEM scalar
    # pts_ref:    (3, TILE) VMEM   (planar x/y/z rows)
    # out_ref:    (1, TILE) VMEM   (lane-dense)
    dx = pts_ref[0:1, :] - center_ref[0]
    dy = pts_ref[1:2, :] - center_ref[1]
    dz = pts_ref[2:3, :] - center_ref[2]
    out_ref[...] = jnp.sqrt(dx * dx + dy * dy + dz * dz) - radius_ref[0]


def _round_up(x, m):
    return ((x + m - 1) // m) * m


@jax.jit
def sphere_sdf(sample_points, center, radius):
    """sample_points: (..., 3) -> (N, 1) signed distance, N = prod(leading dims)."""
    pts = sample_points.reshape(-1, 3).astype(jnp.float32)
    n = pts.shape[0]

    # Planar (3, N) layout: one extra HBM pass for the transpose, but the
    # kernel then runs fully lane-dense.
    # TODO(synk): if the upstream producer can emit (3, N) directly, drop this transpose.
    pts_planar = pts.T  # (3, n)

    # Tile sizing: as big as possible to amortize per-step overhead, while
    # keeping >= 2 grid steps when n allows (v7x megacore sharding).
    n_lanes = _round_up(n, LANE)
    tile = min(MAX_TILE, max(LANE, _round_up(pl.cdiv(n_lanes, 2), LANE)))
    grid = (pl.cdiv(n, tile),)

    center_1d = center.reshape(-1).astype(jnp.float32)  # (3,)
    radius_1d = radius.reshape(-1).astype(jnp.float32)  # (1,)

    out = pl.pallas_call(
        sphere_sdf_kernel,
        out_shape=jax.ShapeDtypeStruct((1, n), jnp.float32),
        grid_spec=pltpu.PrefetchScalarGridSpec(
            num_scalar_prefetch=0,
            grid=grid,
            in_specs=[
                pl.BlockSpec(memory_space=pltpu.SMEM),       # center scalars
                pl.BlockSpec(memory_space=pltpu.SMEM),       # radius scalar
                pl.BlockSpec((3, tile), lambda i: (0, i)),   # planar points
            ],
            out_specs=pl.BlockSpec((1, tile), lambda i: (0, i)),
        ),
        compiler_params=pltpu.CompilerParams(
            dimension_semantics=("parallel",)),
        cost_estimate=pl.CostEstimate(
            flops=10 * n, transcendentals=n, bytes_accessed=16 * n),
    )(center_1d, radius_1d, pts_planar)

    return out.reshape(n, 1)


if __name__ == "__main__":
    key = jax.random.PRNGKey(0)

    # Synthetic "ray bundle" sample points: (n_rays=2, samples_per_ray=64,
    # pts_per_sample=4, 3) -> flattens to (512, 3), matching view(-1, 3).
    sample_points = jax.random.normal(key, (2, 64, 4, 3), dtype=jnp.float32)

    # Deterministic parameters (mirrors cfg.radius.val / cfg.center.val).
    radius = jnp.asarray(1.0, dtype=jnp.float32)
    center = jnp.asarray([0.1, -0.2, 0.3], dtype=jnp.float32)

    out = sphere_sdf(sample_points, center, radius)
    out = jax.block_until_ready(out)

    # Reference check in plain JAX.
    pts = sample_points.reshape(-1, 3)
    ref = jnp.linalg.norm(pts - center.reshape(1, 3), axis=-1, keepdims=True) - radius
    assert out.shape == (pts.shape[0], 1), out.shape
    assert jnp.allclose(out, ref, atol=1e-5, rtol=1e-5), float(jnp.max(jnp.abs(out - ref)))

    print("KERNEL_OK")
</pallas_src>

<mosaic_0001>
module attributes {stable_mosaic.version = 11 : i64} {
  func.func @sphere_sdf_kernel(%arg0: i32, %arg1: memref<3xf32, #tpu.memory_space<smem>>, %arg2: memref<1xf32, #tpu.memory_space<smem>>, %arg3: memref<3x256xf32, #tpu.memory_space<vmem>>, %arg4: memref<1x256xf32, #tpu.memory_space<vmem>>) attributes {dimension_semantics = [#tpu.dimension_semantics<parallel>], iteration_bounds = array<i64: 2>, scalar_prefetch = 0 : i64, scratch_operands = 0 : i64, tpu.core_type = #tpu.core_type<tc>, window_params = [{transform_indices = @transform_0, window_bounds = array<i64: 3>}, {transform_indices = @transform_1, window_bounds = array<i64: 1>}, {transform_indices = @transform_2, window_bounds = array<i64: 3, 256>}, {transform_indices = @transform_3, window_bounds = array<i64: 1, 256>}]} {
    %c0 = arith.constant 0 : index
    %c0_0 = arith.constant 0 : index
    %0 = vector.load %arg3[%c0, %c0_0] : memref<3x256xf32, #tpu.memory_space<vmem>>, vector<1x256xf32>
    %c0_1 = arith.constant 0 : index
    %1 = memref.load %arg1[%c0_1] : memref<3xf32, #tpu.memory_space<smem>>
    %2 = vector.broadcast %1 : f32 to vector<1x256xf32>
    %3 = arith.subf %0, %2 : vector<1x256xf32>
    %c1 = arith.constant 1 : index
    %c0_2 = arith.constant 0 : index
    %4 = vector.load %arg3[%c1, %c0_2] : memref<3x256xf32, #tpu.memory_space<vmem>>, vector<1x256xf32>
    %c1_3 = arith.constant 1 : index
    %5 = memref.load %arg1[%c1_3] : memref<3xf32, #tpu.memory_space<smem>>
    %6 = vector.broadcast %5 : f32 to vector<1x256xf32>
    %7 = arith.subf %4, %6 : vector<1x256xf32>
    %c2 = arith.constant 2 : index
    %c0_4 = arith.constant 0 : index
    %8 = vector.load %arg3[%c2, %c0_4] : memref<3x256xf32, #tpu.memory_space<vmem>>, vector<1x256xf32>
    %c2_5 = arith.constant 2 : index
    %9 = memref.load %arg1[%c2_5] : memref<3xf32, #tpu.memory_space<smem>>
    %10 = vector.broadcast %9 : f32 to vector<1x256xf32>
    %11 = arith.subf %8, %10 : vector<1x256xf32>
    %12 = arith.mulf %3, %3 : vector<1x256xf32>
    %13 = arith.mulf %7, %7 : vector<1x256xf32>
    %14 = arith.addf %12, %13 : vector<1x256xf32>
    %15 = arith.mulf %11, %11 : vector<1x256xf32>
    %16 = arith.addf %14, %15 : vector<1x256xf32>
    %17 = math.sqrt %16 : vector<1x256xf32>
    %c0_6 = arith.constant 0 : index
    %18 = memref.load %arg2[%c0_6] : memref<1xf32, #tpu.memory_space<smem>>
    %19 = vector.broadcast %18 : f32 to vector<1x256xf32>
    %20 = arith.subf %17, %19 : vector<1x256xf32>
    %c0_7 = arith.constant 0 : index
    %c0_8 = arith.constant 0 : index
    %21 = vector.load %arg4[%c0_7, %c0_8] : memref<1x256xf32, #tpu.memory_space<vmem>>, vector<1x256xf32>
    tpu.vector_store %arg4[%c0_7, %c0_8], %20 {strides = array<i32>} : memref<1x256xf32, #tpu.memory_space<vmem>>, vector<1x256xf32>,
    return
  }
  func.func @transform_0(%arg0: i32) -> i32 {
    %c0_i32 = arith.constant 0 : i32
    %c0_i32_0 = arith.constant 0 : i32
    return %c0_i32 : i32
  }
  func.func @transform_1(%arg0: i32) -> i32 {
    %c0_i32 = arith.constant 0 : i32
    %c0_i32_0 = arith.constant 0 : i32
    return %c0_i32 : i32
  }
  func.func @transform_2(%arg0: i32) -> (i32, i32) {
    %c0_i32 = arith.constant 0 : i32
    %c0_i32_0 = arith.constant 0 : i32
    return %c0_i32, %arg0 : i32, i32
  }
  func.func @transform_3(%arg0: i32) -> (i32, i32) {
    %c0_i32 = arith.constant 0 : i32
    %c0_i32_0 = arith.constant 0 : i32
    return %c0_i32, %arg0 : i32, i32
  }
}

</mosaic_0001>

<bundles_post_ra>
// kernel: sphere_sdf.1
= control target key start
LH: loop header
LB: loop body
LE: loop exit
PB: predicated region body
PF: predicated region fallthrough
CT: control target
= control target key end

     0   :  { %s603_s0 = inlined_call_operand.vmem [shape: f32[3], index: 0, kind: input, shape index: {}]   ;;  %s604_s1 = inlined_call_operand.<no memory space> [shape: f32[1], index: 1, kind: input, shape index: {}]   ;;  %s605_s2 = inlined_call_operand.vmem [shape: f32[3,512], index: 2, kind: input, shape index: {}]   ;;  %s606_s3 = inlined_call_operand.hbm [shape: f32[1,512], index: 3, kind: output, shape index: {}]  }
   0x1   :  { %8 = sst [smem:[#allocation2]] %s604_s1 }
   0x2   :  { %9 = vsyncpa [#allocation5], 0 }
   0x3   :  { %10 = vsyncpa [#allocation4], 0 }
   0x4   :  { %12 = vsyncpa [#allocation4 + $0x1], 0  ;;  %s486_s14 = smov 0   ;;  %s488_s15 = smov 0  }
   0x5   :  { %s490_s16 = smov 0   ;;  %s492_s17 = smov 0  }
   0x6 LB: > { %s507_s1 = sadd.s32 4294967295, %s459_s17   ;;  %s307_s18 = sadd.s32 4294967294, %s459_s17   ;;  %s459_s17 = sphi %s492_s17, %s613_s17   ;;  %s455_s16 = sphi %s490_s16, %s612_s16   ;;  %s451_s15 = sphi %s488_s15, %s611_s15   ;;  %s447_s14 = sphi %s486_s14, %s610_s14  }
   0x7   : > { %s511_s19 = sadd.s32 1, %s459_s17   ;;  %s93_s20 = sadd.s32 1, %s455_s16 }
   0x8   : > { %s90_s21 = ssub.s32 %s459_s17, %s511_s19  ;;  %p103_p0 = scmp.ne.s32.totalorder %s455_s16, %s451_s15 }
   0x9   : > { %p91_p1 = scmp.eq.s32.totalorder %s90_s21, 0  ;;  %p104_p2 = scmp.eq.s32.totalorder %s507_s1, 1 }
   0xa   : > { %p109_p3 = scmp.ne.s32.totalorder %s451_s15, %s447_s14  ;;  %p110_p4 = scmp.eq.s32.totalorder %s307_s18, 1 }
   0xb   : > { %s522_s22 = scalar_select %p91_p1, %s455_s16, %s93_s20  }
   0xc   : > { %p524_p5 = por %p104_p2, %p103_p0  ;;  %p528_p6 = por %p110_p4, %p109_p3 }
   0xd   : > { %p308_p7 = scmp.ge.s32.totalorder %s459_s17, 1  ;;  %p117_p8 = scmp.lt.s32.totalorder %s459_s17, 3 }
   0xe   : > { %p340_p9 = scmp.eq.s32.totalorder %s507_s1, 0  ;;  %s130_s28 = sshll.u32 %s603_s0, 4  ;;  %s131_s28 = int_to_ptr.vmem [resolvable:$true] %s130_s28 }
   0xf   : > { %p535_p10 = pnand %p308_p7, %p117_p8  ;;  %s378_s29 = scalar_lea.vmem %s131_s28, 16 }
  0x10   : > { %p379_p13 = scmp.ne.s32.totalorder %s131_s28, %s378_s29  ;;  %p386_p3 = scmp.lt.s32.totalorder %s131_s28, %s131_s28 }
  0x11   : > { %p332_p11 = pneg %p535_p10  ;;  %p387_p4 = scmp.lt.s32.totalorder %s378_s29, %s378_s29 }
  0x13   : > { %p333_p12 = pnand %p340_p9, %p332_p11  ;;  %p388_p7 = por %p387_p4, %p386_p3 }
  0x15   : > { %p380_p0 = pneg %p333_p12 }
  0x17   : > { %p381_p1 = pnand %p380_p0, %p379_p13 }
  0x19   : > { %p382_p2 = pneg %p381_p1 }
  0x1b   : > { %p389_p8 = pnand %p388_p7, %p382_p2 }
  0x1d   : > { %392 = shalt.err (!%p389_p8)
}
  0x1e   : > { %s461_s30 = smov [#allocation3]   ;;  %155 = sbr.rel (%p535_p10) target bundleno = 87 (0x57), region = 32 }
  0x1f   : > { %335 = dma.vmem_to_smem (!%p333_p12), %s131_s28, 16, %s461_s30, [#allocation5]  }
  0x25   : > { %438 = dma.done.wait (%p340_p9), [#allocation5], 16  }
  0x26   : > { %440 = vsyncadd (%p340_p9), [#allocation5], 4294967280 }
  0x27   : > { %161 = sfence }
  0x28   : > { %s314_s4 = sshll.u32 %s507_s1, 1  ;;  %s188_s5 = sld [smem:[#allocation3]]  ;;  %v216_v16 = vlaneseq }
  0x29   : > { %p181_p11 = scmp.lt.s32.totalorder %s314_s4, 3  ;;  %s317_s6 = sld [smem:[#allocation3 + $0x1]] }
  0x2a   : > { %s319_s7 = sld [smem:[#allocation3 + $0x2]]  ;;  %s177_s12 = sand.u32 1, %s451_s15   ;;  %vm218_vm2 = vcmp.lt.s32.totalorder %v216_v16, 256 }
  0x2b   : > { %s615_s4 = smov (!%p181_p11, %s314_s4), 3  ;;  %s213_s13 = sld [smem:[#allocation2]] }
  0x2c   : > { %s315_s8 = sshll.u32 %s615_s4, 2  ;;  %s313_s18 = sshll.u32 %s177_s12, 1 }
  0x2d   : > { %s184_s11 = scalar_lea.vmem %s605_s2, %s315_s8  ;;  %s179_s20 = scalar_lea.vmem [#allocation6], %s313_s18 }
  0x2e   : > { %v187_v0 = vld [vmem:[%s184_s11] ss:$4 sm:$0x3]  ;;  %v189_v1 = vstv %s188_s5  ;;  %v316_v2 = vld [vmem:[%s184_s11 + $0x1] ss:$4 sm:$0x3] }
  0x2f   : > { %v318_v3 = vld [vmem:[%s184_s11 + $0x2] ss:$4 sm:$0x3]  ;;  %v190_v4 = vsub.f32 %v187_v0, %v189_v1  ;;  %v194_v5 = vstv %s317_s6  ;;  %s236_s21 = sshll.u32 %s179_s20, 4  ;;  %s325_s25 = sshll.u32 %s507_s1, 5  ;;  %s558_s21 = int_to_ptr.vmem [resolvable:$true] %s236_s21 }
  0x30   : > { %v199_v6 = vstv %s319_s7  ;;  %v195_v7 = vsub.f32 %v316_v2, %v194_v5  ;;  %s563_s28 = scalar_lea.hbm %s606_s3, %s325_s25  ;;  %s222_s29 = scalar_lea.sflag [#allocation4], %s177_s12 }
  0x31   : > { %v200_v8 = vsub.f32 %v318_v3, %v199_v6  ;;  %v201_v9 = vmul.f32 %v190_v4, %v190_v4  ;;  %v214_v18 = vstv %s213_s13  ;;  %s393_s30 = scalar_lea.vmem %s558_s21, 32  ;;  %s462_s1 = smov [#allocation6]  }
  0x32   : > { %v202_v10 = vmul.f32 %v195_v7, %v195_v7  ;;  %p394_p9 = scmp.ne.s32.totalorder %s558_s21, %s393_s30  ;;  %s397_s4 = sshll.u32 %s462_s1, 4  ;;  %s398_s4 = int_to_ptr.vmem [resolvable:$false] %s397_s4 }
  0x33   : > { %v204_v11 = vmul.f32 %v200_v8, %v200_v8  ;;  %s399_s5 = scalar_lea.vmem %s398_s4, 64  ;;  %p400_p13 = scmp.lt.s32.totalorder %s558_s21, %s398_s4 }
  0x34   : > { %v203_v12 = vadd.f32 %v202_v10, %v201_v9  ;;  %p395_p10 = pnand %p394_p9, %p524_p5  ;;  %p401_p0 = scmp.lt.s32.totalorder %s399_s5, %s393_s30 }
  0x36   : > { %v205_v13 = vadd.f32 %v204_v11, %v203_v12  ;;  %p396_p12 = pneg %p395_p10  ;;  %p402_p1 = por %p401_p0, %p400_p13 }
  0x38   : > { %376 = vrsqrt.f32 %v205_v13  ;;  %vm208_vm0 = vcmp.eq.f32.partialorder %v205_v13, inf  ;;  %v211_v15 = vand.u32 2147483648, %v205_v13  ;;  %vm210_vm1 = vcmp.eq.f32.partialorder %v205_v13, 0.0  ;;  %p403_p2 = pnand %p402_p1, %p396_p12 }
  0x42   : > { %v377_v14 = vpop.eup %376 }
  0x43   : > { %v207_v17 = vmul.f32 %v377_v14, %v205_v13 }
  0x45   : > { %v209_v19 = vsel %vm208_vm0, %v205_v13, %v207_v17 }
  0x46   : > { %v212_v20 = vsel %vm210_vm1, %v211_v15, %v209_v19 }
  0x47   : > { %v215_v21 = vsub.f32 %v212_v20, %v214_v18 }
  0x49   : > { %220 = vst.msk [vmem:[%s179_s20] sm:$0x3] %vm218_vm2, %v215_v21 }
  0x4a   : > { %406 = shalt.err (!%p403_p2)
}
  0x4b   : > { %s407_s6 = scalar_lea.hbm %s563_s28, 32  ;;  %s411_s9 = scalar_lea.hbm %s606_s3, 64 }
  0x4c   : > { %p408_p3 = scmp.ne.s32.totalorder %s563_s28, %s407_s6  ;;  %p412_p8 = scmp.lt.u32.totalorder %s563_s28, %s606_s3 }
  0x4d   : > { %p413_p11 = scmp.lt.u32.totalorder %s411_s9, %s407_s6  ;;  %p415_p10 = scmp.lt.u32.totalorder %s407_s6, %s563_s28 }
  0x4e   : > { %p409_p4 = pnand %p408_p3, %p524_p5 }
  0x4f   : > { %p414_p9 = por %p413_p11, %p412_p8 }
  0x50   : > { %p410_p7 = pneg %p409_p4 }
  0x51   : > { %p416_p12 = por %p415_p10, %p414_p9 }
  0x53   : > { %p417_p13 = pnand %p416_p12, %p410_p7 }
  0x55   : > { %420 = shalt.err (!%p417_p13)
}
  0x56   : > { %330 = dma.vmem_to_hbm [thread:$0]  (%p524_p5), %s558_s21, 32, %s563_s28, %s222_s29  }
  0x57 PF: > { %p342_p0 = scmp.ge.s32.totalorder %s459_s17, 2  ;;  %s248_s12 = sand.u32 1, %s447_s14  }
  0x58   : > { %s249_s13 = scalar_lea.sflag [#allocation4], %s248_s12 }
  0x59   : > { %p337_p1 = pnand %p342_p0, %p528_p6 }
  0x5b   : > { %442 = dma.done.wait (!%p337_p1), %s249_s13, 32  }
  0x5c   : > { %444 = vsyncadd (!%p337_p1), %s249_s13, 4294967264  ;;  %p15_p2 = scmp.ge.s32.totalorder %s511_s19, 4   ;;  %s610_s14 = smov %s451_s15 }
  0x5d   : > { %s611_s15 = smov %s455_s16  ;;  %s612_s16 = smov %s522_s22 }
  0x5e   : > { %s613_s17 = smov %s511_s19  ;;  %17 = sbr.rel (!%p15_p2) target bundleno = 6 (0x6), region = 74 }
  0x65   :  { %254 = vsyncpa [#allocation4], 1 }
  0x66   :  { %256 = vsyncpa [#allocation4 + $0x1], 1 }
  0x67   :  { %257 = vsyncpa [#allocation5], 1 }
  0x68   :  { %259 = vsyncpa [#allocation5 + $0x1], 1 }

</bundles_post_ra>
